<compile_context>
chip_gen: v7x
topology: tpu7x:2x2x1
jax: 0.10.0
libtpu: 0.0.40
codegen_flags: <defaults>
</compile_context>

<pallas_src>
import functools

import jax
import jax.numpy as jnp
from jax import lax
from jax.experimental import pallas as pl
from jax.experimental.pallas import tpu as pltpu

NEG_SLOPE = 0.01  # torch.nn.LeakyReLU default


def _conv_kernel(x_ref, w_ref, b_ref, o_ref, patch_ref, *, K, s, C, Ho, Ws, L, NB):
    """One (batch-block, O-tile) grid step.

    x_ref:     (1, s*s*C, NB*L)    space-to-depth slab of NB images (compute dtype)
    w_ref:     (Ot, K*K*C)         weight tile, taps-major / channel-minor (compute dtype)
    b_ref:     (Ot, 1)             f32 bias tile (resident per O tile)
    o_ref:     (1, Ot, NB*Ho*Ws)   f32 lane-dense output slab
    patch_ref: (K*K*C, NB*Ho*Ws)   VMEM im2col scratch (compute dtype)
    """
    HoWs = Ho * Ws
    # Gather the K*K taps (static contiguous slices of the s2d slab) into one im2col matrix
    # so the whole conv is a single MXU contraction of depth K*K*C.
    for n in range(NB):
        for kh in range(K):
            for kw in range(K):
                phase = (kh % s) * s + (kw % s)
                tap = kh * K + kw
                start = n * L + (kh // s) * Ws + (kw // s)        # static element offset
                patch_ref[tap * C:(tap + 1) * C, n * HoWs:(n + 1) * HoWs] = (
                    x_ref[0, phase * C:(phase + 1) * C, start:start + HoWs])
    acc = jnp.dot(w_ref[...], patch_ref[...],
                  preferred_element_type=jnp.float32)             # one matmul, f32 acc
    acc = acc + b_ref[...]                                        # (Ot,1) broadcast on lanes
    o_ref[0] = jnp.where(acc >= 0.0, acc, NEG_SLOPE * acc).astype(o_ref.dtype)


def _pick_out_tile(O):
    # Full O when small; otherwise a multiple-of-8 divisor <= 256 (256-deep/wide targets
    # v6e/v7x MXU; also keeps the per-step accumulator bounded).
    if O <= 256:
        return O
    for t in range(256, 0, -8):
        if O % t == 0:
            return t
    return O


def _pick_batch_block(N, HoWs, img_block_bytes):
    # Fold enough images into the lane axis to reach >=128 output lanes, bounded by a
    # per-block VMEM budget (Pallas double-buffers the block).
    budget = 6 * 1024 * 1024
    want = max(1, -(-128 // HoWs))
    cap = max(1, budget // max(img_block_bytes, 1))
    target = max(1, min(N, want, cap))
    for nb in range(target, 0, -1):
        if N % nb == 0:
            return nb
    return 1


def _vmem_limit_bytes():
    cap = 64 * 1024 * 1024                      # conservative fallback (v7x per-core VMEM)
    try:
        cap = int(getattr(pltpu.get_tpu_info(), "vmem_capacity_bytes", cap))
    except Exception:
        pass
    return min(96 * 1024 * 1024, (3 * cap) // 4)   # ~96 MiB on v5e/v6e, ~48 MiB on v7x


@functools.partial(jax.jit, static_argnames=("stride", "compute_dtype"))
def conv_leakyrelu(x, w, b, stride=2, compute_dtype=jnp.bfloat16):
    """x: (N, C, H, W) f32; w: (O, C, K, K); b: (O,). Returns (N, O, Ho, Wo) f32."""
    N, C, H, W = x.shape
    O, Cw, K, Kw = w.shape
    assert Cw == C and Kw == K
    s = int(stride)
    assert s >= 1 and H >= K and W >= K
    # Only VALID padding, dilation=1, groups=1 (the nn.Conv2d defaults used by this module).
    Ho = (H - K) // s + 1
    Wo = (W - K) // s + 1
    Hs = -(-H // s)
    Ws = -(-W // s)
    # Guards for the contiguous-span tap trick (garbage columns must land at j >= Wo and the
    # single spare row must cover the row overhang).
    assert (K - 1) // s + Ho <= Hs, "tap row overhang exceeds padded s2d plane"
    assert (K - 1) // s + Wo <= Ws, "tap col overhang exceeds padded s2d plane width"

    L = (Hs + 1) * Ws            # +1 spare row so full-width tap spans never read OOB
    HoWs = Ho * Ws
    itemsize = jnp.dtype(compute_dtype).itemsize

    Ot = _pick_out_tile(O)
    img_block_bytes = s * s * C * L * itemsize + Ot * HoWs * 4
    NB = _pick_batch_block(N, HoWs, img_block_bytes)
    num_nb = N // NB
    num_ob = O // Ot

    # --- single fused layout pass (space-to-depth), written in compute dtype --------------
    # TODO(synk): fuse this pass into the kernel (strided in-kernel phase extraction / strided
    # DMA) to remove the remaining extra HBM round-trip over x entirely.
    xc = x.astype(compute_dtype)
    x_p = jnp.pad(xc, ((0, 0), (0, 0), (0, Hs * s - H), (0, Ws * s - W)))
    # (num_nb, NB, C, Hs, s, Ws, s) -> (num_nb, s, s, C, NB, Hs, Ws)
    x_s2d = x_p.reshape(num_nb, NB, C, Hs, s, Ws, s).transpose(0, 4, 6, 2, 1, 3, 5)
    x_s2d = jnp.pad(x_s2d, ((0, 0),) * 5 + ((0, 1), (0, 0)))      # spare row per phase plane
    x_flat = x_s2d.reshape(num_nb, s * s * C, NB * L)

    # taps-major / channel-minor weights (O, K*K*C); f32 bias (O, 1) for the VPU epilogue
    w_r = w.transpose(0, 2, 3, 1).reshape(O, K * K * C).astype(compute_dtype)
    b_r = b.reshape(O, 1).astype(jnp.float32)

    kernel = functools.partial(_conv_kernel, K=K, s=s, C=C, Ho=Ho, Ws=Ws, L=L, NB=NB)
    out = pl.pallas_call(
        kernel,
        out_shape=jax.ShapeDtypeStruct((num_nb, O, NB * HoWs), jnp.float32),
        grid=(num_nb, num_ob),
        in_specs=[
            pl.BlockSpec((1, s * s * C, NB * L), lambda i, j: (i, 0, 0)),  # pipelined images
            pl.BlockSpec((Ot, K * K * C), lambda i, j: (j, 0)),            # weight tile
            pl.BlockSpec((Ot, 1), lambda i, j: (j, 0)),                    # bias tile
        ],
        out_specs=pl.BlockSpec((1, Ot, NB * HoWs), lambda i, j: (i, j, 0)),
        scratch_shapes=[pltpu.VMEM((K * K * C, NB * HoWs), compute_dtype)],
        compiler_params=pltpu.CompilerParams(
            dimension_semantics=("parallel", "parallel"),
            vmem_limit_bytes=_vmem_limit_bytes(),
        ),
    )(x_flat, w_r, b_r)

    # (num_nb, O, NB*Ho*Ws) -> NCHW. Transpose / Wo crop are skipped when not needed and
    # otherwise fuse into one output-sized XLA pass (output is ~1/s^2 the input bytes).
    # TODO(synk): for very large single images, add a third grid axis tiling Ho row-blocks.
    out = out.reshape(num_nb, O, NB, Ho, Ws)
    if NB > 1:
        out = out.transpose(0, 2, 1, 3, 4)
    out = out.reshape(N, O, Ho, Ws)
    if Wo != Ws:
        out = out[:, :, :, :Wo]
    return out


if __name__ == "__main__":
    # Module config (deterministic synthetic parameters, no checkpoint load)
    in_channels, out_channels, kernel_size = 4, 8, 3
    N, H, W = 2, 16, 16

    key = jax.random.PRNGKey(0)
    kx, kw_key, kb = jax.random.split(key, 3)
    x = jax.random.normal(kx, (N, in_channels, H, W), dtype=jnp.float32)
    # Conv2d weight: (out_channels, in_channels, K, K), bias: (out_channels,)
    fan_in = in_channels * kernel_size * kernel_size
    bound = 1.0 / (fan_in ** 0.5)
    weight = jax.random.uniform(kw_key, (out_channels, in_channels, kernel_size, kernel_size),
                                minval=-bound, maxval=bound, dtype=jnp.float32)
    bias = jax.random.uniform(kb, (out_channels,), minval=-bound, maxval=bound,
                              dtype=jnp.float32)

    # Default bf16 MXU path (perf path on all generations) and exact f32 path.
    out_bf16 = jax.block_until_ready(conv_leakyrelu(x, weight, bias, stride=2))
    out_f32 = jax.block_until_ready(
        conv_leakyrelu(x, weight, bias, stride=2, compute_dtype=jnp.float32))

    # Reference check (plain-JAX conv + LeakyReLU)
    ref = lax.conv_general_dilated(
        x, weight, window_strides=(2, 2), padding="VALID",
        dimension_numbers=("NCHW", "OIHW", "NCHW"))
    ref = ref + bias.reshape(1, -1, 1, 1)
    ref = jnp.where(ref >= 0, ref, NEG_SLOPE * ref)

    Ho = (H - kernel_size) // 2 + 1
    Wo = (W - kernel_size) // 2 + 1
    assert out_f32.shape == (N, out_channels, Ho, Wo)
    assert out_bf16.shape == (N, out_channels, Ho, Wo)
    assert jnp.allclose(out_f32, ref, atol=1e-4, rtol=1e-4), \
        float(jnp.max(jnp.abs(out_f32 - ref)))
    assert jnp.allclose(out_bf16, ref, atol=5e-2, rtol=5e-2), \
        float(jnp.max(jnp.abs(out_bf16 - ref)))
    print("KERNEL_OK")
</pallas_src>

<mosaic_0001>
module attributes {stable_mosaic.version = 11 : i64} {
  func.func @_conv_kernel(%arg0: i32, %arg1: i32, %arg2: memref<1x16x144xbf16, #tpu.memory_space<vmem>>, %arg3: memref<8x36xbf16, #tpu.memory_space<vmem>>, %arg4: memref<8x1xf32, #tpu.memory_space<vmem>>, %arg5: memref<1x8x112xf32, #tpu.memory_space<vmem>>, %arg6: memref<36x112xbf16, #tpu.memory_space<vmem>>) attributes {dimension_semantics = [#tpu.dimension_semantics<parallel>, #tpu.dimension_semantics<parallel>], iteration_bounds = array<i64: 1, 1>, scalar_prefetch = 0 : i64, scratch_operands = 1 : i64, tpu.core_type = #tpu.core_type<tc>, window_params = [{transform_indices = @transform_0, window_bounds = array<i64: 1, 16, 144>}, {transform_indices = @transform_1, window_bounds = array<i64: 8, 36>}, {transform_indices = @transform_2, window_bounds = array<i64: 8, 1>}, {transform_indices = @transform_3, window_bounds = array<i64: 1, 8, 112>}]} {
    %c0 = arith.constant 0 : index
    %c0_0 = arith.constant 0 : index
    %c0_1 = arith.constant 0 : index
    %0 = vector.load %arg2[%c0, %c0_0, %c0_1] : memref<1x16x144xbf16, #tpu.memory_space<vmem>>, vector<1x4x56xbf16>
    %1 = vector.shape_cast %0 : vector<1x4x56xbf16> to vector<4x56xbf16>
    %c0_2 = arith.constant 0 : index
    %c0_3 = arith.constant 0 : index
    %2 = vector.load %arg6[%c0_2, %c0_3] : memref<36x112xbf16, #tpu.memory_space<vmem>>, vector<4x56xbf16>
    tpu.vector_store %arg6[%c0_2, %c0_3], %1 {strides = array<i32>} : memref<36x112xbf16, #tpu.memory_space<vmem>>, vector<4x56xbf16>,
    %c0_4 = arith.constant 0 : index
    %c4 = arith.constant 4 : index
    %c0_5 = arith.constant 0 : index
    %3 = vector.load %arg2[%c0_4, %c4, %c0_5] : memref<1x16x144xbf16, #tpu.memory_space<vmem>>, vector<1x4x56xbf16>
    %4 = vector.shape_cast %3 : vector<1x4x56xbf16> to vector<4x56xbf16>
    %c4_6 = arith.constant 4 : index
    %c0_7 = arith.constant 0 : index
    %5 = vector.load %arg6[%c4_6, %c0_7] : memref<36x112xbf16, #tpu.memory_space<vmem>>, vector<4x56xbf16>
    tpu.vector_store %arg6[%c4_6, %c0_7], %4 {strides = array<i32>} : memref<36x112xbf16, #tpu.memory_space<vmem>>, vector<4x56xbf16>,
    %c0_8 = arith.constant 0 : index
    %c0_9 = arith.constant 0 : index
    %c1 = arith.constant 1 : index
    %6 = vector.load %arg2[%c0_8, %c0_9, %c1] : memref<1x16x144xbf16, #tpu.memory_space<vmem>>, vector<1x4x56xbf16>
    %7 = vector.shape_cast %6 : vector<1x4x56xbf16> to vector<4x56xbf16>
    %c8 = arith.constant 8 : index
    %c0_10 = arith.constant 0 : index
    %8 = vector.load %arg6[%c8, %c0_10] : memref<36x112xbf16, #tpu.memory_space<vmem>>, vector<4x56xbf16>
    tpu.vector_store %arg6[%c8, %c0_10], %7 {strides = array<i32>} : memref<36x112xbf16, #tpu.memory_space<vmem>>, vector<4x56xbf16>,
    %c0_11 = arith.constant 0 : index
    %c8_12 = arith.constant 8 : index
    %c0_13 = arith.constant 0 : index
    %9 = vector.load %arg2[%c0_11, %c8_12, %c0_13] : memref<1x16x144xbf16, #tpu.memory_space<vmem>>, vector<1x4x56xbf16>
    %10 = vector.shape_cast %9 : vector<1x4x56xbf16> to vector<4x56xbf16>
    %c12 = arith.constant 12 : index
    %c0_14 = arith.constant 0 : index
    %11 = vector.load %arg6[%c12, %c0_14] : memref<36x112xbf16, #tpu.memory_space<vmem>>, vector<4x56xbf16>
    tpu.vector_store %arg6[%c12, %c0_14], %10 {strides = array<i32>} : memref<36x112xbf16, #tpu.memory_space<vmem>>, vector<4x56xbf16>,
    %c0_15 = arith.constant 0 : index
    %c12_16 = arith.constant 12 : index
    %c0_17 = arith.constant 0 : index
    %12 = vector.load %arg2[%c0_15, %c12_16, %c0_17] : memref<1x16x144xbf16, #tpu.memory_space<vmem>>, vector<1x4x56xbf16>
    %13 = vector.shape_cast %12 : vector<1x4x56xbf16> to vector<4x56xbf16>
    %c16 = arith.constant 16 : index
    %c0_18 = arith.constant 0 : index
    %14 = vector.load %arg6[%c16, %c0_18] : memref<36x112xbf16, #tpu.memory_space<vmem>>, vector<4x56xbf16>
    tpu.vector_store %arg6[%c16, %c0_18], %13 {strides = array<i32>} : memref<36x112xbf16, #tpu.memory_space<vmem>>, vector<4x56xbf16>,
    %c0_19 = arith.constant 0 : index
    %c8_20 = arith.constant 8 : index
    %c1_21 = arith.constant 1 : index
    %15 = vector.load %arg2[%c0_19, %c8_20, %c1_21] : memref<1x16x144xbf16, #tpu.memory_space<vmem>>, vector<1x4x56xbf16>
    %16 = vector.shape_cast %15 : vector<1x4x56xbf16> to vector<4x56xbf16>
    %c20 = arith.constant 20 : index
    %c0_22 = arith.constant 0 : index
    %17 = vector.load %arg6[%c20, %c0_22] : memref<36x112xbf16, #tpu.memory_space<vmem>>, vector<4x56xbf16>
    tpu.vector_store %arg6[%c20, %c0_22], %16 {strides = array<i32>} : memref<36x112xbf16, #tpu.memory_space<vmem>>, vector<4x56xbf16>,
    %c0_23 = arith.constant 0 : index
    %c0_24 = arith.constant 0 : index
    %c8_25 = arith.constant 8 : index
    %18 = vector.load %arg2[%c0_23, %c0_24, %c8_25] : memref<1x16x144xbf16, #tpu.memory_space<vmem>>, vector<1x4x56xbf16>
    %19 = vector.shape_cast %18 : vector<1x4x56xbf16> to vector<4x56xbf16>
    %c24 = arith.constant 24 : index
    %c0_26 = arith.constant 0 : index
    %20 = vector.load %arg6[%c24, %c0_26] : memref<36x112xbf16, #tpu.memory_space<vmem>>, vector<4x56xbf16>
    tpu.vector_store %arg6[%c24, %c0_26], %19 {strides = array<i32>} : memref<36x112xbf16, #tpu.memory_space<vmem>>, vector<4x56xbf16>,
    %c0_27 = arith.constant 0 : index
    %c4_28 = arith.constant 4 : index
    %c8_29 = arith.constant 8 : index
    %21 = vector.load %arg2[%c0_27, %c4_28, %c8_29] : memref<1x16x144xbf16, #tpu.memory_space<vmem>>, vector<1x4x56xbf16>
    %22 = vector.shape_cast %21 : vector<1x4x56xbf16> to vector<4x56xbf16>
    %c28 = arith.constant 28 : index
    %c0_30 = arith.constant 0 : index
    %23 = vector.load %arg6[%c28, %c0_30] : memref<36x112xbf16, #tpu.memory_space<vmem>>, vector<4x56xbf16>
    tpu.vector_store %arg6[%c28, %c0_30], %22 {strides = array<i32>} : memref<36x112xbf16, #tpu.memory_space<vmem>>, vector<4x56xbf16>,
    %c0_31 = arith.constant 0 : index
    %c0_32 = arith.constant 0 : index
    %c9 = arith.constant 9 : index
    %24 = vector.load %arg2[%c0_31, %c0_32, %c9] : memref<1x16x144xbf16, #tpu.memory_space<vmem>>, vector<1x4x56xbf16>
    %25 = vector.shape_cast %24 : vector<1x4x56xbf16> to vector<4x56xbf16>
    %c32 = arith.constant 32 : index
    %c0_33 = arith.constant 0 : index
    %26 = vector.load %arg6[%c32, %c0_33] : memref<36x112xbf16, #tpu.memory_space<vmem>>, vector<4x56xbf16>
    tpu.vector_store %arg6[%c32, %c0_33], %25 {strides = array<i32>} : memref<36x112xbf16, #tpu.memory_space<vmem>>, vector<4x56xbf16>,
    %c0_34 = arith.constant 0 : index
    %c0_35 = arith.constant 0 : index
    %c72 = arith.constant 72 : index
    %27 = vector.load %arg2[%c0_34, %c0_35, %c72] : memref<1x16x144xbf16, #tpu.memory_space<vmem>>, vector<1x4x56xbf16>
    %28 = vector.shape_cast %27 : vector<1x4x56xbf16> to vector<4x56xbf16>
    %c0_36 = arith.constant 0 : index
    %c56 = arith.constant 56 : index
    %29 = vector.load %arg6[%c0_36, %c56] : memref<36x112xbf16, #tpu.memory_space<vmem>>, vector<4x56xbf16>
    tpu.vector_store %arg6[%c0_36, %c56], %28 {strides = array<i32>} : memref<36x112xbf16, #tpu.memory_space<vmem>>, vector<4x56xbf16>,
    %c0_37 = arith.constant 0 : index
    %c4_38 = arith.constant 4 : index
    %c72_39 = arith.constant 72 : index
    %30 = vector.load %arg2[%c0_37, %c4_38, %c72_39] : memref<1x16x144xbf16, #tpu.memory_space<vmem>>, vector<1x4x56xbf16>
    %31 = vector.shape_cast %30 : vector<1x4x56xbf16> to vector<4x56xbf16>
    %c4_40 = arith.constant 4 : index
    %c56_41 = arith.constant 56 : index
    %32 = vector.load %arg6[%c4_40, %c56_41] : memref<36x112xbf16, #tpu.memory_space<vmem>>, vector<4x56xbf16>
    tpu.vector_store %arg6[%c4_40, %c56_41], %31 {strides = array<i32>} : memref<36x112xbf16, #tpu.memory_space<vmem>>, vector<4x56xbf16>,
    %c0_42 = arith.constant 0 : index
    %c0_43 = arith.constant 0 : index
    %c73 = arith.constant 73 : index
    %33 = vector.load %arg2[%c0_42, %c0_43, %c73] : memref<1x16x144xbf16, #tpu.memory_space<vmem>>, vector<1x4x56xbf16>
    %34 = vector.shape_cast %33 : vector<1x4x56xbf16> to vector<4x56xbf16>
    %c8_44 = arith.constant 8 : index
    %c56_45 = arith.constant 56 : index
    %35 = vector.load %arg6[%c8_44, %c56_45] : memref<36x112xbf16, #tpu.memory_space<vmem>>, vector<4x56xbf16>
    tpu.vector_store %arg6[%c8_44, %c56_45], %34 {strides = array<i32>} : memref<36x112xbf16, #tpu.memory_space<vmem>>, vector<4x56xbf16>,
    %c0_46 = arith.constant 0 : index
    %c8_47 = arith.constant 8 : index
    %c72_48 = arith.constant 72 : index
    %36 = vector.load %arg2[%c0_46, %c8_47, %c72_48] : memref<1x16x144xbf16, #tpu.memory_space<vmem>>, vector<1x4x56xbf16>
    %37 = vector.shape_cast %36 : vector<1x4x56xbf16> to vector<4x56xbf16>
    %c12_49 = arith.constant 12 : index
    %c56_50 = arith.constant 56 : index
    %38 = vector.load %arg6[%c12_49, %c56_50] : memref<36x112xbf16, #tpu.memory_space<vmem>>, vector<4x56xbf16>
    tpu.vector_store %arg6[%c12_49, %c56_50], %37 {strides = array<i32>} : memref<36x112xbf16, #tpu.memory_space<vmem>>, vector<4x56xbf16>,
    %c0_51 = arith.constant 0 : index
    %c12_52 = arith.constant 12 : index
    %c72_53 = arith.constant 72 : index
    %39 = vector.load %arg2[%c0_51, %c12_52, %c72_53] : memref<1x16x144xbf16, #tpu.memory_space<vmem>>, vector<1x4x56xbf16>
    %40 = vector.shape_cast %39 : vector<1x4x56xbf16> to vector<4x56xbf16>
    %c16_54 = arith.constant 16 : index
    %c56_55 = arith.constant 56 : index
    %41 = vector.load %arg6[%c16_54, %c56_55] : memref<36x112xbf16, #tpu.memory_space<vmem>>, vector<4x56xbf16>
    tpu.vector_store %arg6[%c16_54, %c56_55], %40 {strides = array<i32>} : memref<36x112xbf16, #tpu.memory_space<vmem>>, vector<4x56xbf16>,
    %c0_56 = arith.constant 0 : index
    %c8_57 = arith.constant 8 : index
    %c73_58 = arith.constant 73 : index
    %42 = vector.load %arg2[%c0_56, %c8_57, %c73_58] : memref<1x16x144xbf16, #tpu.memory_space<vmem>>, vector<1x4x56xbf16>
    %43 = vector.shape_cast %42 : vector<1x4x56xbf16> to vector<4x56xbf16>
    %c20_59 = arith.constant 20 : index
    %c56_60 = arith.constant 56 : index
    %44 = vector.load %arg6[%c20_59, %c56_60] : memref<36x112xbf16, #tpu.memory_space<vmem>>, vector<4x56xbf16>
    tpu.vector_store %arg6[%c20_59, %c56_60], %43 {strides = array<i32>} : memref<36x112xbf16, #tpu.memory_space<vmem>>, vector<4x56xbf16>,
    %c0_61 = arith.constant 0 : index
    %c0_62 = arith.constant 0 : index
    %c80 = arith.constant 80 : index
    %45 = vector.load %arg2[%c0_61, %c0_62, %c80] : memref<1x16x144xbf16, #tpu.memory_space<vmem>>, vector<1x4x56xbf16>
    %46 = vector.shape_cast %45 : vector<1x4x56xbf16> to vector<4x56xbf16>
    %c24_63 = arith.constant 24 : index
    %c56_64 = arith.constant 56 : index
    %47 = vector.load %arg6[%c24_63, %c56_64] : memref<36x112xbf16, #tpu.memory_space<vmem>>, vector<4x56xbf16>
    tpu.vector_store %arg6[%c24_63, %c56_64], %46 {strides = array<i32>} : memref<36x112xbf16, #tpu.memory_space<vmem>>, vector<4x56xbf16>,
    %c0_65 = arith.constant 0 : index
    %c4_66 = arith.constant 4 : index
    %c80_67 = arith.constant 80 : index
    %48 = vector.load %arg2[%c0_65, %c4_66, %c80_67] : memref<1x16x144xbf16, #tpu.memory_space<vmem>>, vector<1x4x56xbf16>
    %49 = vector.shape_cast %48 : vector<1x4x56xbf16> to vector<4x56xbf16>
    %c28_68 = arith.constant 28 : index
    %c56_69 = arith.constant 56 : index
    %50 = vector.load %arg6[%c28_68, %c56_69] : memref<36x112xbf16, #tpu.memory_space<vmem>>, vector<4x56xbf16>
    tpu.vector_store %arg6[%c28_68, %c56_69], %49 {strides = array<i32>} : memref<36x112xbf16, #tpu.memory_space<vmem>>, vector<4x56xbf16>,
    %c0_70 = arith.constant 0 : index
    %c0_71 = arith.constant 0 : index
    %c81 = arith.constant 81 : index
    %51 = vector.load %arg2[%c0_70, %c0_71, %c81] : memref<1x16x144xbf16, #tpu.memory_space<vmem>>, vector<1x4x56xbf16>
    %52 = vector.shape_cast %51 : vector<1x4x56xbf16> to vector<4x56xbf16>
    %c32_72 = arith.constant 32 : index
    %c56_73 = arith.constant 56 : index
    %53 = vector.load %arg6[%c32_72, %c56_73] : memref<36x112xbf16, #tpu.memory_space<vmem>>, vector<4x56xbf16>
    tpu.vector_store %arg6[%c32_72, %c56_73], %52 {strides = array<i32>} : memref<36x112xbf16, #tpu.memory_space<vmem>>, vector<4x56xbf16>,
    %c0_74 = arith.constant 0 : index
    %c0_75 = arith.constant 0 : index
    %54 = vector.load %arg3[%c0_74, %c0_75] : memref<8x36xbf16, #tpu.memory_space<vmem>>, vector<8x36xbf16>
    %c0_76 = arith.constant 0 : index
    %c0_77 = arith.constant 0 : index
    %55 = vector.load %arg6[%c0_76, %c0_77] : memref<36x112xbf16, #tpu.memory_space<vmem>>, vector<36x112xbf16>
    %cst = arith.constant dense<0.000000e+00> : vector<8x112xf32>
    %56 = tpu.matmul %54, %55, %cst {dimension_numbers = #tpu.dot_dimension_numbers<[1], [0], [0], [1], [0, 0, 1, 1], [], []>} : vector<8x36xbf16>, vector<36x112xbf16>, vector<8x112xf32> -> vector<8x112xf32>
    %c0_78 = arith.constant 0 : index
    %c0_79 = arith.constant 0 : index
    %57 = vector.load %arg4[%c0_78, %c0_79] : memref<8x1xf32, #tpu.memory_space<vmem>>, vector<8x1xf32>
    %58 = vector.broadcast %57 : vector<8x1xf32> to vector<8x112xf32>
    %59 = arith.addf %56, %58 : vector<8x112xf32>
    %cst_80 = arith.constant 0.000000e+00 : f32
    %60 = vector.broadcast %cst_80 : f32 to vector<8x112xf32>
    %61 = arith.cmpf oge, %59, %60 : vector<8x112xf32>
    %cst_81 = arith.constant 0.00999999977 : f32
    %62 = vector.broadcast %cst_81 : f32 to vector<8x112xf32>
    %63 = arith.mulf %62, %59 : vector<8x112xf32>
    %64 = arith.select %61, %59, %63 : vector<8x112xi1>, vector<8x112xf32>
    %c0_82 = arith.constant 0 : index
    %c0_83 = arith.constant 0 : index
    %c0_84 = arith.constant 0 : index
    %65 = vector.load %arg5[%c0_82, %c0_83, %c0_84] : memref<1x8x112xf32, #tpu.memory_space<vmem>>, vector<1x8x112xf32>
    %66 = vector.shape_cast %65 : vector<1x8x112xf32> to vector<8x112xf32>
    %67 = vector.shape_cast %64 : vector<8x112xf32> to vector<1x8x112xf32>
    tpu.vector_store %arg5[%c0_82, %c0_83, %c0_84], %67 {strides = array<i32>} : memref<1x8x112xf32, #tpu.memory_space<vmem>>, vector<1x8x112xf32>,
    return
  }
  func.func @transform_0(%arg0: i32, %arg1: i32) -> (i32, i32, i32) {
    %c0_i32 = arith.constant 0 : i32
    %c0_i32_0 = arith.constant 0 : i32
    %c0_i32_1 = arith.constant 0 : i32
    return %arg0, %c0_i32, %c0_i32_0 : i32, i32, i32
  }
  func.func @transform_1(%arg0: i32, %arg1: i32) -> (i32, i32) {
    %c0_i32 = arith.constant 0 : i32
    %c0_i32_0 = arith.constant 0 : i32
    return %arg1, %c0_i32 : i32, i32
  }
  func.func @transform_2(%arg0: i32, %arg1: i32) -> (i32, i32) {
    %c0_i32 = arith.constant 0 : i32
    %c0_i32_0 = arith.constant 0 : i32
    return %arg1, %c0_i32 : i32, i32
  }
  func.func @transform_3(%arg0: i32, %arg1: i32) -> (i32, i32, i32) {
    %c0_i32 = arith.constant 0 : i32
    %c0_i32_0 = arith.constant 0 : i32
    return %arg0, %arg1, %c0_i32 : i32, i32, i32
  }
}

</mosaic_0001>

<bundles_post_ra>
// kernel: conv_leakyrelu.1
= control target key start
LH: loop header
LB: loop body
LE: loop exit
PB: predicated region body
PF: predicated region fallthrough
CT: control target
= control target key end

     0   :  { %s254_s16 = smov 111   ;;  %s255_s17 = smov 112   ;;  %vm16_vm0 = vcmask 451584   ;;  %vm19_vm1 = vcmask 453634   ;;  %v257_v13 = vmov 0.0   ;;  %vm262_vm2 = vmmov 0   ;;  %s375_s0 = inlined_call_operand.vmem [shape: bf16[1,16,144], index: 0, kind: input, shape index: {}]   ;;  %s376_s2 = inlined_call_operand.vmem [shape: f32[8,1], index: 2, kind: input, shape index: {}]   ;;  %s377_s1 = inlined_call_operand.vmem [shape: bf16[8,36], index: 1, kind: input, shape index: {}]   ;;  %s378_s3 = inlined_call_operand.vmem [shape: f32[1,8,112], index: 3, kind: output, shape index: {}]  }
   0x1   :  { %v77_v0 = vld [vmem:[%s375_s0] sm:$0x33]  ;;  %v70_v2 = vld [vmem:[%s375_s0] sm:$0xc]  ;;  %v101_v4 = vld [vmem:[%s375_s0 + $0x8] sm:$0x33]  ;;  %230 = vmatprep.subr.bf16.mxu0 %v257_v13  ;;  %236 = vmatprep.mubr.msk.bf16.mxu0 %vm262_vm2, %v257_v13 }
   0x2   :  { %v63_v1 = vld [vmem:[%s375_s0] sm:$0x3]  ;;  %79 = vrot.lane.b32.xlu0 %v77_v0, %s254_s16  ;;  %v86_v5 = vld [vmem:[%s375_s0 + $0x8] sm:$0x3]  ;;  %s256_s26 = smov 127   ;;  %v103_v6 = vrot.slane %v101_v4, 6 }
   0x3   :  { %65 = vrot.lane.b32.xlu1 %v63_v1, %s255_s17  ;;  %v21_v3 = vld [vmem:[%s375_s0] sm:$0x3]  ;;  %v88_v7 = vrot.slane %v86_v5, 6  ;;  %v18_v9 = vld [vmem:[%s375_s0] sm:$0xc]  ;;  %s258_s14 = smov 104  }
   0x4   :  { %v15_v8 = vld [vmem:[%s375_s0] sm:$0x3]  ;;  %20 = vst.msk [vmem:[#allocation2] sm:$0xc] %vm19_vm1, %v18_v9  ;;  %v27_v10 = vld [vmem:[%s375_s0 + $0x8] sm:$0x3] }
   0x5   :  { %17 = vst.msk [vmem:[#allocation2] sm:$0x3] %vm16_vm0, %v15_v8  ;;  %v32_v11 = vld [vmem:[%s375_s0 + $0x8] sm:$0xc]  ;;  %v29_v12 = vrot.slane %v27_v10, 6  ;;  %s259_s20 = smov 120  }
   0x6   :  { %23 = vrot.lane.b32.xlu0 %v21_v3, %s256_s26  ;;  %v220_v14 = vrot.slane %v32_v11, 10  ;;  %v119_v15 = vld [vmem:[%s375_s0] sm:$0xcc]  ;;  %v110_v16 = vld [vmem:[%s375_s0] sm:$0x33]  ;;  %s260_s28 = smov 103  }
   0x7   :  { %72 = vrot.lane.b32.xlu1 %v70_v2, %s255_s17  ;;  %v38_v17 = vld [vmem:[%s375_s0 + $0x8] sm:$0x3]  ;;  %31 = vst.msk [vmem:[#allocation2 + $0x4] sm:$0xc] %vm19_vm1, %v29_v12  ;;  %v45_v19 = vld [vmem:[%s375_s0] sm:$0x3] }
   0x8   :  { %37 = vst.msk [vmem:[#allocation2 + $0x8] sm:$0x3] %vm16_vm0, %v220_v14  ;;  %v40_v18 = vrot.slane %v38_v17, 6  ;;  %v93_v20 = vld [vmem:[%s375_s0 + $0x8] sm:$0xc]  ;;  %s261_s29 = smov 119  }
   0x9   :  { %v221_v21 = vrot.slane %v93_v20, 10  ;;  %v51_v22 = vld [vmem:[%s375_s0] sm:$0xc]  ;;  %v127_v23 = vld [vmem:[%s375_s0] sm:$0x33]  ;;  %v263_v25 = vmov 0  }
   0xa   :  { %89 = vrot.lane.b32.xlu0 %v88_v7, %s255_s17  ;;  %v57_v24 = vld [vmem:[%s375_s0] sm:$0x3]  ;;  %vm68_vm3 = vcmask 910784   ;;  %vm82_vm4 = vcmask 908288   ;;  %vm75_vm5 = vcmask 912834   ;;  %vm115_vm6 = vcmask 850944  }
   0xb   :  { %104 = vrot.lane.b32.xlu1 %v103_v6, %s254_s16  ;;  %250 = vset.pattern.permute.xlu0 %v263_v25  ;;  %v142_v26 = vld [vmem:[%s376_s2] sm:$0xff]  ;;  %vm132_vm7 = vcmask 842752   ;;  %vm167_vm8 = vcmask 1041408   ;;  %vm163_vm9 = vcmask 293888   ;;  %vm214_vm11 = vcmask 916480  }
   0xc   :  { %v136_v55 = vld [vmem:[%s377_s1] sm:$0xf] }
   0xe   :  { %112 = vrot.lane.b32.xlu0 %v110_v16, %s258_s14 }
   0xf   :  { %121 = vrot.lane.b32.xlu1 %v119_v15, %s258_s14 }
  0x12   :  { %41 = vrot.lane.b32.xlu0 %v40_v18, %s256_s26 }
  0x13   :  { %47 = vrot.lane.b32.xlu1 %v45_v19, %s259_s20 }
  0x16   :  { %53 = vrot.lane.b32.xlu0 %v51_v22, %s259_s20 }
  0x17   :  { %97 = vrot.lane.b32.xlu1 %v221_v21, %s255_s17 }
  0x1a   :  { %129 = vrot.lane.b32.xlu0 %v127_v23, %s260_s28 }
  0x1b   :  { %59 = vrot.lane.b32.xlu1 %v57_v24, %s261_s29 }
  0x1e   :  { %145 = vperm.xlu0 %250, %v142_v26  }
  0x74   :  { %v80_v27 = vpop.permute.xlu0 %79 }
  0x75   :  { %v66_v28 = vpop.permute.xlu1 %65  ;;  %v81_v29 = vrot.slane %v80_v27, 4 }
  0x76   :  { %69 = vst.msk [vmem:[#allocation2] sm:$0x3] %vm68_vm3, %v66_v28 }
  0x77   :  { %v83_v32 = vsel %vm82_vm4, %v80_v27, %v81_v29 }
  0x78   :  { %v24_v31 = vpop.permute.xlu0 %23 }
  0x79   :  { %v73_v30 = vpop.permute.xlu1 %72  ;;  %26 = vst.msk [vmem:[#allocation2 + $0x4] sm:$0x3] %vm16_vm0, %v24_v31 }
  0x7a   :  { %76 = vst.msk [vmem:[#allocation2] sm:$0xc] %vm75_vm5, %v73_v30 }
  0x7b   :  { %85 = vst.msk [vmem:[#allocation2 + $0x4] sm:$0x3] %vm68_vm3, %v83_v32 }
  0x7c   :  { %v90_v34 = vpop.permute.xlu0 %89 }
  0x7d   :  { %v105_v33 = vpop.permute.xlu1 %104  ;;  %92 = vst.msk [vmem:[#allocation2 + $0x4] sm:$0xc] %vm75_vm5, %v90_v34 }
  0x7e   :  { %v106_v37 = vrot.slane %v105_v33, 4 }
  0x80   :  { %v113_v36 = vpop.permute.xlu0 %112  ;;  %v107_v42 = vsel %vm82_vm4, %v105_v33, %v106_v37 }
  0x81   :  { %v122_v35 = vpop.permute.xlu1 %121  ;;  %v114_v38 = vrot.slane %v113_v36, 4 }
  0x82   :  { %v123_v43 = vrot.slane %v122_v35, 4 }
  0x83   :  { %v116_v44 = vsel %vm115_vm6, %v113_v36, %v114_v38 }
  0x84   :  { %v42_v40 = vpop.permute.xlu0 %41  ;;  %v251_v41 = vld [vmem:[#allocation2] sm:$0xff]   ;;  %v124_v47 = vsel %vm115_vm6, %v122_v35, %v123_v43 }
  0x85   :  { %v48_v39 = vpop.permute.xlu1 %47  ;;  %44 = vst.msk [vmem:[#allocation2 + $0x8] sm:$0xc] %vm19_vm1, %v42_v40  ;;  %231 = vmatpush3.bf16.msra.mxu0 %v251_v41 }
  0x86   :  { %50 = vst.msk [vmem:[#allocation2 + $0xc] sm:$0x3] %vm16_vm0, %v48_v39  ;;  %232 = vmatprep.subr.bf16.mxu0 %v257_v13 }
  0x87   :  { %118 = vst.msk [vmem:[#allocation2 + $0xc] sm:$0x3] %vm68_vm3, %v116_v44 }
  0x88   :  { %109 = vst.msk [vmem:[#allocation2 + $0x8] sm:$0xc] %vm75_vm5, %v107_v42  ;;  %v54_v46 = vpop.permute.xlu0 %53 }
  0x89   :  { %v98_v45 = vpop.permute.xlu1 %97  ;;  %56 = vst.msk [vmem:[#allocation2 + $0xc] sm:$0xc] %vm19_vm1, %v54_v46 }
  0x8a   :  { %100 = vst.msk [vmem:[#allocation2 + $0x8] sm:$0x3] %vm68_vm3, %v98_v45 }
  0x8b   :  { %126 = vst.msk [vmem:[#allocation2 + $0xc] sm:$0xc] %vm75_vm5, %v124_v47 }
  0x8c   :  { %v130_v48 = vpop.permute.xlu0 %129 }
  0x8d   :  { %v60_v49 = vpop.permute.xlu1 %59  ;;  %v131_v50 = vrot.slane %v130_v48, 4 }
  0x8e   :  { %62 = vst.msk [vmem:[#allocation2 + $0x10] sm:$0x3] %vm16_vm0, %v60_v49 }
  0x8f   :  { %v133_v51 = vsel %vm132_vm7, %v130_v48, %v131_v50 }
  0x90   :  { %135 = vst.msk [vmem:[#allocation2 + $0x10] sm:$0x3] %vm68_vm3, %v133_v51 }
  0x92   :  { %v252_v52 = vld [vmem:[#allocation2 + $0x8] sm:$0xff]  }
  0x93   :  { %233 = vmatpush3.bf16.msra.mxu0 %v252_v52 }
  0x94   :  { %234 = vmatprep.subr.bf16.mxu0 %v257_v13 }
  0x97   :  { %v253_v53 = vld [vmem:[#allocation2 + $0x10] ss:$0 sps:$4 sm:$0x33]  }
  0x98   :  { %v169_v54 = vsel %vm167_vm8, %v253_v53, 0 }
  0x99   :  { %235 = vmatpush3.bf16.msra.mxu0 %v169_v54 }
  0x9c   :  { %237 = vmatmul.mubr.msk.bf16.vlgmr.msra.gmra.mrb[0].mxu0 %vm163_vm9, %v136_v55 }
  0x9d   :  { %v146_v56 = vpop.permute.xlu0 %145 }
 0x16f   :  { %v205_v57 = vpop.f32.mrb[0].mxu0 }
 0x170   :  { %v206_v58 = vadd.f32 %v205_v57, %v146_v56  ;;  %v238_v59 = vpop.f32.mrb[1].mxu0 }
 0x171   :  { %v208_v60 = vpop.f32.mrb[2].mxu0 }
 0x172   :  { %vm211_vm10 = vcmp.ge.f32.partialorder %v206_v58, 0.0  ;;  %v212_v61 = vmul.f32 0.01, %v206_v58  ;;  %v239_v62 = vpop.f32.mrb[3].mxu0 }
 0x174   :  { %v213_v63 = vsel %vm211_vm10, %v206_v58, %v212_v61 }
 0x175   :  { %215 = vst.msk [vmem:[%s378_s3] sm:$0xff] %vm214_vm11, %v213_v63 }

</bundles_post_ra>
